<compile_context>
chip_gen: v5e
topology: v5e:2x2
jax: 0.10.0
libtpu: 0.0.40
codegen_flags: <defaults>
</compile_context>

<pallas_src>
import jax
import jax.numpy as jnp
from jax.experimental import pallas as pl
from jax.experimental.pallas import tpu as pltpu


def _round_up(x, m):
    return ((x + m - 1) // m) * m


def _pick_tile(total, preferred, align):
    """Largest t <= preferred with t % align == 0 and total % t == 0; else full dim."""
    if total % align != 0:
        return total
    t = min((preferred // align) * align, total)
    while t >= align:
        if total % t == 0:
            return t
        t -= align
    return total


def _patch_proj_kernel(x_ref, w_ref, b_ref, o_ref, acc_ref):
    """One (tm, tn) output tile, accumulated over the K grid axis."""
    k = pl.program_id(2)

    @pl.when(k == 0)
    def _():
        acc_ref[...] = jnp.zeros_like(acc_ref)

    acc_ref[...] += jnp.dot(
        x_ref[...], w_ref[...], preferred_element_type=jnp.float32
    )

    @pl.when(k == pl.num_programs(2) - 1)
    def _():
        o_ref[...] = (acc_ref[...] + b_ref[...].astype(jnp.float32)).astype(o_ref.dtype)


def _extract_patches(x, patch_size, stride):
    """im2col for a k x k / stride s conv. Returns (M, K) with (c, i, j) flatten order."""
    B, C_in, H, W = x.shape
    P, S = patch_size, stride
    Hp = (H - P) // S + 1
    Wp = (W - P) // S + 1
    if S == P and H % P == 0 and W % P == 0:
        # Non-overlapping fast path: pure reshape/transpose.
        patches = x.reshape(B, C_in, Hp, P, Wp, P)
    else:
        # Overlapping / non-divisible: gather the needed rows and columns.
        row_idx = (jnp.arange(Hp)[:, None] * S + jnp.arange(P)[None, :]).reshape(-1)
        col_idx = (jnp.arange(Wp)[:, None] * S + jnp.arange(P)[None, :]).reshape(-1)
        xg = jnp.take(x, row_idx, axis=2)
        xg = jnp.take(xg, col_idx, axis=3)          # (B, C, Hp*P, Wp*P)
        patches = xg.reshape(B, C_in, Hp, P, Wp, P)
    patches = patches.transpose(0, 2, 4, 1, 3, 5)    # (B, Hp, Wp, C, P, P)
    return patches.reshape(B * Hp * Wp, C_in * P * P), Hp, Wp


def patch_embed(x, weight, bias, *, patch_size, stride):
    """PatchEmbed forward.

    x:      (B, C_in, H, W)
    weight: (E, C_in, P, P)   -- Conv2d weight
    bias:   (E,)              -- Conv2d bias
    Returns (x_out, y_out): (B, Hp*Wp, E) and (B, Wp*Hp, E), matching the
    PyTorch module (norm_layer=None -> Identity).
    """
    B, C_in, H, W = x.shape
    E = weight.shape[0]
    P = patch_size

    patches, Hp, Wp = _extract_patches(x, P, stride)
    M, K = patches.shape
    w2d = weight.reshape(E, K).T        # (K, E)
    b2d = bias.reshape(1, E)

    # --- tile selection (lane-dense E, big row tiles, VMEM-safe on all chips) ---
    tm = min(256, _round_up(M, 8))      # multiple of 8 sublanes
    m_pad = _round_up(M, tm)
    if m_pad != M:
        patches = jnp.pad(patches, ((0, m_pad - M), (0, 0)))
    tn = _pick_tile(E, 512, 128)        # lane-dense output tiles
    tk = _pick_tile(K, 512, 128)

    grid = (m_pad // tm, E // tn, K // tk)

    out2d = pl.pallas_call(
        _patch_proj_kernel,
        out_shape=jax.ShapeDtypeStruct((m_pad, E), x.dtype),
        grid_spec=pltpu.PrefetchScalarGridSpec(
            num_scalar_prefetch=0,
            grid=grid,
            in_specs=[
                pl.BlockSpec((tm, tk), lambda i, j, k: (i, k)),   # patches
                pl.BlockSpec((tk, tn), lambda i, j, k: (k, j)),   # projection weight
                pl.BlockSpec((1, tn), lambda i, j, k: (0, j)),    # bias
            ],
            out_specs=pl.BlockSpec((tm, tn), lambda i, j, k: (i, j)),
            scratch_shapes=[pltpu.VMEM((tm, tn), jnp.float32)],
        ),
        compiler_params=pltpu.CompilerParams(
            dimension_semantics=("parallel", "parallel", "arbitrary"),
        ),
    )(patches, w2d, b2d)

    out = out2d[:M].reshape(B, Hp, Wp, E)
    x_out = out.reshape(B, Hp * Wp, E)                             # row-major patch order
    y_out = out.transpose(0, 2, 1, 3).reshape(B, Wp * Hp, E)       # col-major patch order
    # norm_layer=None in the module -> nn.Identity, so no normalization is applied.
    return x_out, y_out


def _reference(x, weight, bias, patch_size, stride):
    out = jax.lax.conv_general_dilated(
        x, weight, window_strides=(stride, stride), padding="VALID",
        dimension_numbers=("NCHW", "OIHW", "NCHW"),
    ) + bias[None, :, None, None]
    B, E, Hp, Wp = out.shape
    x_out = out.reshape(B, E, Hp * Wp).transpose(0, 2, 1)
    y_out = out.transpose(0, 1, 3, 2).reshape(B, E, Wp * Hp).transpose(0, 2, 1)
    return x_out, y_out


def _check(x, weight, bias, P, S):
    x_out, y_out = patch_embed(x, weight, bias, patch_size=P, stride=S)
    x_out, y_out = jax.block_until_ready((x_out, y_out))
    x_ref, y_ref = _reference(x, weight, bias, P, S)
    assert x_out.shape == x_ref.shape and y_out.shape == y_ref.shape
    assert jnp.allclose(x_out, x_ref, atol=2e-4, rtol=2e-4), "x_out mismatch vs reference"
    assert jnp.allclose(y_out, y_ref, atol=2e-4, rtol=2e-4), "y_out mismatch vs reference"


if __name__ == "__main__":
    key = jax.random.PRNGKey(0)
    kx, kw, kb, kx2 = jax.random.split(key, 4)

    # Small but representative default config: 32x32 image, 3 channels,
    # 8x8 non-overlapping patches, embed 128.
    B, C_in, H, W = 2, 3, 32, 32
    P, S, E = 8, 8, 128

    x = jax.random.normal(kx, (B, C_in, H, W), dtype=jnp.float32)
    weight = jax.random.normal(kw, (E, C_in, P, P), dtype=jnp.float32) * 0.05
    bias = jax.random.normal(kb, (E,), dtype=jnp.float32) * 0.1
    _check(x, weight, bias, P, S)

    # Overlapping-stride config (stride != patch_size) exercises the gather path.
    x2 = jax.random.normal(kx2, (B, C_in, 16, 16), dtype=jnp.float32)
    _check(x2, weight, bias, 8, 4)

    print("KERNEL_OK")
</pallas_src>

<mosaic_0001>
module attributes {stable_mosaic.version = 11 : i64} {
  func.func @_patch_proj_kernel(%arg0: i32, %arg1: i32, %arg2: i32, %arg3: memref<32x192xf32, #tpu.memory_space<vmem>>, %arg4: memref<192x128xf32, #tpu.memory_space<vmem>>, %arg5: memref<1x128xf32, #tpu.memory_space<vmem>>, %arg6: memref<32x128xf32, #tpu.memory_space<vmem>>, %arg7: memref<32x128xf32, #tpu.memory_space<vmem>>) attributes {dimension_semantics = [#tpu.dimension_semantics<parallel>, #tpu.dimension_semantics<parallel>, #tpu.dimension_semantics<arbitrary>], iteration_bounds = array<i64: 1, 1, 1>, scalar_prefetch = 0 : i64, scratch_operands = 1 : i64, tpu.core_type = #tpu.core_type<tc>, window_params = [{transform_indices = @transform_0, window_bounds = array<i64: 32, 192>}, {transform_indices = @transform_1, window_bounds = array<i64: 192, 128>}, {transform_indices = @transform_2, window_bounds = array<i64: 1, 128>}, {transform_indices = @transform_3, window_bounds = array<i64: 32, 128>}]} {
    %c0_i32 = arith.constant 0 : i32
    %0 = arith.cmpi eq, %arg2, %c0_i32 : i32
    %1 = arith.extui %0 : i1 to i32
    %c0_i32_0 = arith.constant 0 : i32
    %2 = arith.cmpi ne, %1, %c0_i32_0 : i32
    scf.if %2 {
      %cst_10 = arith.constant 0.000000e+00 : f32
      %12 = vector.broadcast %cst_10 : f32 to vector<32x128xf32>
      %c0_11 = arith.constant 0 : index
      %c0_12 = arith.constant 0 : index
      %13 = vector.load %arg7[%c0_11, %c0_12] : memref<32x128xf32, #tpu.memory_space<vmem>>, vector<32x128xf32>
      tpu.vector_store %arg7[%c0_11, %c0_12], %12 {strides = array<i32>} : memref<32x128xf32, #tpu.memory_space<vmem>>, vector<32x128xf32>,
    } else {
    }
    %c0 = arith.constant 0 : index
    %c0_1 = arith.constant 0 : index
    %3 = vector.load %arg7[%c0, %c0_1] : memref<32x128xf32, #tpu.memory_space<vmem>>, vector<32x128xf32>
    %c0_2 = arith.constant 0 : index
    %c0_3 = arith.constant 0 : index
    %4 = vector.load %arg3[%c0_2, %c0_3] : memref<32x192xf32, #tpu.memory_space<vmem>>, vector<32x192xf32>
    %c0_4 = arith.constant 0 : index
    %c0_5 = arith.constant 0 : index
    %5 = vector.load %arg4[%c0_4, %c0_5] : memref<192x128xf32, #tpu.memory_space<vmem>>, vector<192x128xf32>
    %cst = arith.constant dense<0.000000e+00> : vector<32x128xf32>
    %6 = tpu.matmul %4, %5, %cst {dimension_numbers = #tpu.dot_dimension_numbers<[1], [0], [0], [1], [0, 0, 1, 1], [], []>} : vector<32x192xf32>, vector<192x128xf32>, vector<32x128xf32> -> vector<32x128xf32>
    %7 = arith.addf %3, %6 : vector<32x128xf32>
    %c0_6 = arith.constant 0 : index
    %c0_7 = arith.constant 0 : index
    %8 = vector.load %arg7[%c0_6, %c0_7] : memref<32x128xf32, #tpu.memory_space<vmem>>, vector<32x128xf32>
    tpu.vector_store %arg7[%c0_6, %c0_7], %7 {strides = array<i32>} : memref<32x128xf32, #tpu.memory_space<vmem>>, vector<32x128xf32>,
    %c0_i32_8 = arith.constant 0 : i32
    %9 = arith.cmpi eq, %arg2, %c0_i32_8 : i32
    %10 = arith.extui %9 : i1 to i32
    %c0_i32_9 = arith.constant 0 : i32
    %11 = arith.cmpi ne, %10, %c0_i32_9 : i32
    scf.if %11 {
      %c0_10 = arith.constant 0 : index
      %c0_11 = arith.constant 0 : index
      %12 = vector.load %arg7[%c0_10, %c0_11] : memref<32x128xf32, #tpu.memory_space<vmem>>, vector<32x128xf32>
      %c0_12 = arith.constant 0 : index
      %c0_13 = arith.constant 0 : index
      %13 = vector.load %arg5[%c0_12, %c0_13] : memref<1x128xf32, #tpu.memory_space<vmem>>, vector<1x128xf32>
      %14 = vector.broadcast %13 : vector<1x128xf32> to vector<32x128xf32>
      %15 = arith.addf %12, %14 : vector<32x128xf32>
      %c0_14 = arith.constant 0 : index
      %c0_15 = arith.constant 0 : index
      %16 = vector.load %arg6[%c0_14, %c0_15] : memref<32x128xf32, #tpu.memory_space<vmem>>, vector<32x128xf32>
      tpu.vector_store %arg6[%c0_14, %c0_15], %15 {strides = array<i32>} : memref<32x128xf32, #tpu.memory_space<vmem>>, vector<32x128xf32>,
    } else {
    }
    return
  }
  func.func @transform_0(%arg0: i32, %arg1: i32, %arg2: i32) -> (i32, i32) {
    %c0_i32 = arith.constant 0 : i32
    return %arg0, %arg2 : i32, i32
  }
  func.func @transform_1(%arg0: i32, %arg1: i32, %arg2: i32) -> (i32, i32) {
    %c0_i32 = arith.constant 0 : i32
    return %arg2, %arg1 : i32, i32
  }
  func.func @transform_2(%arg0: i32, %arg1: i32, %arg2: i32) -> (i32, i32) {
    %c0_i32 = arith.constant 0 : i32
    %c0_i32_0 = arith.constant 0 : i32
    return %c0_i32, %arg1 : i32, i32
  }
  func.func @transform_3(%arg0: i32, %arg1: i32, %arg2: i32) -> (i32, i32) {
    %c0_i32 = arith.constant 0 : i32
    return %arg0, %arg1 : i32, i32
  }
}

</mosaic_0001>

<bundles_post_ra>
// kernel: tpu_custom_call.1
= control target key start
LH: loop header
LB: loop body
LE: loop exit
PB: predicated region body
PF: predicated region fallthrough
CT: control target
= control target key end

     0   :  { %8 = vsyncpa [#allocation4], 0  ;;  %s380_s0 = inlined_call_operand.hbm [shape: f32[32,192], index: 0, kind: input, shape index: {}]   ;;  %s381_s1 = inlined_call_operand.hbm [shape: f32[192,128], index: 1, kind: input, shape index: {}]   ;;  %s382_s2 = inlined_call_operand.vmem [shape: f32[1,128], index: 2, kind: input, shape index: {}]   ;;  %s383_s3 = inlined_call_operand.hbm [shape: f32[32,128], index: 3, kind: output, shape index: {}]  }
   0x1   :  { %9 = vsyncpa [#allocation7], 0 }
   0x2   :  { %10 = vsyncpa [#allocation5], 0  ;;  %s15_s14 = sshll.u32 %s380_s0, 4  ;;  %s331_s15 = smov [#allocation3]   ;;  %s16_s14 = int_to_ptr.hbm [resolvable:$true] %s15_s14 }
   0x3   :  { %s17_s16 = sshll.u32 %s331_s15, 4  ;;  %s28_s19 = sshll.u32 %s381_s1, 4  ;;  %s18_s16 = int_to_ptr.vmem [resolvable:$true] %s17_s16  ;;  %s29_s19 = int_to_ptr.hbm [resolvable:$true] %s28_s19 }
   0x4   :  { %s332_s20 = smov 256   ;;  %s333_s21 = smov 16  }
   0x5   :  { %23 = dma.hbm_to_vmem [thread:$0]  %s16_s14, 1024, %s18_s16, [#allocation4], %s332_s20, %s332_s20, %s333_s21  }
   0x6   :  { %s334_s22 = smov [#allocation6]   ;;  %s335_s24 = smov 128  }
   0x7   :  { %s30_s23 = sshll.u32 %s334_s22, 4  ;;  %s336_s25 = smov 8   ;;  %s31_s23 = int_to_ptr.vmem [resolvable:$true] %s30_s23 }
   0x8   :  { %36 = dma.hbm_to_vmem [thread:$0]  %s29_s19, 3072, %s31_s23, [#allocation7], %s335_s24, %s335_s24, %s336_s25  }
   0x9   :  { %325 = dma.done.wait [#allocation4], 1024  }
   0xa   :  { %326 = vsyncadd [#allocation4], 4294966272 }
   0xb   :  { %327 = dma.done.wait [#allocation7], 3072  }
   0xc   :  { %328 = vsyncadd [#allocation7], 4294964224  ;;  %v82_v0 = vld [vmem:[#allocation6 + $0x78] sm:$0xff]  ;;  %v81_v1 = vld [vmem:[#allocation6 + $0x70] sm:$0xff]  ;;  %vm91_vm0 = vcmask 523264   ;;  %s337_s26 = smov [#allocation8]  }
   0xd   :  { %104 = vmatpush.msra.mxu0 %v82_v0  ;;  %213 = vmatpush.msra.mxu2 %v82_v0  ;;  %v90_v2 = vld [vmem:[#allocation6 + $0xb8] sm:$0xff]  ;;  %v80_v3 = vld [vmem:[#allocation6 + $0x68] sm:$0xff]  ;;  %v89_v4 = vld [vmem:[#allocation6 + $0xb0] sm:$0xff]  ;;  %s193_s27 = sshll.u32 %s337_s26, 4  ;;  %s194_s27 = int_to_ptr.vmem [resolvable:$true] %s193_s27 }
   0xe   :  { %214 = vmatpush.msra.mxu3 %v82_v0  ;;  %141 = vmatpush.msra.mxu1 %v90_v2  ;;  %v88_v5 = vld [vmem:[#allocation6 + $0xa8] sm:$0xff]  ;;  %v79_v6 = vld [vmem:[#allocation6 + $0x60] sm:$0xff]  ;;  %v78_v8 = vld [vmem:[#allocation6 + $0x58] sm:$0xff] }
   0xf   :  { %105 = vmatpush.msra.mxu0 %v81_v1  ;;  %215 = vmatpush.msra.mxu2 %v81_v1  ;;  %v87_v7 = vld [vmem:[#allocation6 + $0xa0] sm:$0xff]  ;;  %v86_v9 = vld [vmem:[#allocation6 + $0x98] sm:$0xff]  ;;  %v77_v10 = vld [vmem:[#allocation6 + $0x50] sm:$0xff] }
  0x10   :  { %216 = vmatpush.msra.mxu3 %v81_v1  ;;  %142 = vmatpush.msra.mxu1 %v89_v4  ;;  %v85_v11 = vld [vmem:[#allocation6 + $0x90] sm:$0xff]  ;;  %v76_v12 = vld [vmem:[#allocation6 + $0x48] sm:$0xff]  ;;  %v75_v14 = vld [vmem:[#allocation6 + $0x40] sm:$0xff] }
  0x11   :  { %106 = vmatpush.msra.mxu0 %v80_v3  ;;  %217 = vmatpush.msra.mxu2 %v80_v3  ;;  %v84_v13 = vld [vmem:[#allocation6 + $0x88] sm:$0xff]  ;;  %v83_v15 = vld [vmem:[#allocation6 + $0x80] sm:$0xff]  ;;  %v74_v16 = vld [vmem:[#allocation6 + $0x38] sm:$0xff] }
  0x12   :  { %218 = vmatpush.msra.mxu3 %v80_v3  ;;  %143 = vmatpush.msra.mxu1 %v88_v5  ;;  %v60_v17 = vld [vmem:[#allocation3 + $0x8] sm:$0xff]  ;;  %v73_v18 = vld [vmem:[#allocation6 + $0x30] sm:$0xff]  ;;  %v71_v20 = vld [vmem:[#allocation6 + $0x20] sm:$0xff] }
  0x13   :  { %107 = vmatpush.msra.mxu0 %v79_v6  ;;  %219 = vmatpush.msra.mxu2 %v79_v6  ;;  %v72_v19 = vld [vmem:[#allocation6 + $0x28] sm:$0xff]  ;;  %v70_v21 = vld [vmem:[#allocation6 + $0x18] sm:$0xff]  ;;  %v69_v23 = vld [vmem:[#allocation6 + $0x10] sm:$0xff] }
  0x14   :  { %220 = vmatpush.msra.mxu3 %v79_v6  ;;  %144 = vmatpush.msra.mxu1 %v87_v7  ;;  %v62_v22 = vld [vmem:[#allocation3 + $0x18] sm:$0xff]  ;;  %v68_v24 = vld [vmem:[#allocation6 + $0x8] sm:$0xff]  ;;  %v67_v25 = vld [vmem:[#allocation6] sm:$0xff] }
  0x15   :  { %108 = vmatpush.msra.mxu0 %v78_v8  ;;  %221 = vmatpush.msra.mxu2 %v78_v8  ;;  %v59_v26 = vld [vmem:[#allocation3] sm:$0xff]  ;;  %v61_v27 = vld [vmem:[#allocation3 + $0x10] sm:$0xff]  ;;  %v64_v29 = vld [vmem:[#allocation3 + $0x28] sm:$0xff] }
  0x16   :  { %222 = vmatpush.msra.mxu3 %v78_v8  ;;  %145 = vmatpush.msra.mxu1 %v86_v9  ;;  %v63_v28 = vld [vmem:[#allocation3 + $0x20] sm:$0xff]  ;;  %v65_v30 = vld [vmem:[#allocation3 + $0x30] sm:$0xff]  ;;  %v66_v31 = vld [vmem:[#allocation3 + $0x38] sm:$0xff] }
  0x17   :  { %109 = vmatpush.msra.mxu0 %v77_v10  ;;  %223 = vmatpush.msra.mxu2 %v77_v10  ;;  %v252_v34 = vld [vmem:[%s382_s2] ss:$0 sm:$0xff]  ;;  %s195_s2 = sshll.u32 %s383_s3, 4  ;;  %s196_s2 = int_to_ptr.hbm [resolvable:$true] %s195_s2 }
  0x18   :  { %224 = vmatpush.msra.mxu3 %v77_v10  ;;  %146 = vmatpush.msra.mxu1 %v85_v11 }
  0x19   :  { %110 = vmatpush.msra.mxu0 %v76_v12  ;;  %225 = vmatpush.msra.mxu2 %v76_v12 }
  0x1a   :  { %226 = vmatpush.msra.mxu3 %v76_v12  ;;  %147 = vmatpush.msra.mxu1 %v84_v13 }
  0x1b   :  { %111 = vmatpush.msra.mxu0 %v75_v14  ;;  %227 = vmatpush.msra.mxu2 %v75_v14 }
  0x1c   :  { %228 = vmatpush.msra.mxu3 %v75_v14  ;;  %148 = vmatpush.msra.mxu1 %v83_v15 }
  0x1d   :  { %112 = vmatpush.msra.mxu0 %v74_v16  ;;  %229 = vmatpush.msra.mxu2 %v74_v16 }
  0x1e   :  { %230 = vmatpush.msra.mxu3 %v74_v16  ;;  %209 = vmatmul.msk.f32.vlgmr.msra.gmra.mxu1 %vm91_vm0, %v60_v17 }
  0x1f   :  { %113 = vmatpush.msra.mxu0 %v73_v18  ;;  %231 = vmatpush.msra.mxu2 %v73_v18 }
  0x20   :  { %232 = vmatpush.msra.mxu3 %v73_v18 }
  0x21   :  { %114 = vmatpush.msra.mxu0 %v72_v19  ;;  %233 = vmatpush.msra.mxu2 %v72_v19 }
  0x22   :  { %234 = vmatpush.msra.mxu3 %v72_v19 }
  0x23   :  { %115 = vmatpush.msra.mxu0 %v71_v20  ;;  %235 = vmatpush.msra.mxu2 %v71_v20 }
  0x24   :  { %236 = vmatpush.msra.mxu3 %v71_v20 }
  0x25   :  { %116 = vmatpush.msra.mxu0 %v70_v21  ;;  %237 = vmatpush.msra.mxu2 %v70_v21 }
  0x26   :  { %238 = vmatpush.msra.mxu3 %v70_v21  ;;  %210 = vmatmul.msk.f32.gmra.mxu1 %vm91_vm0, %v62_v22 }
  0x27   :  { %117 = vmatpush.msra.mxu0 %v69_v23  ;;  %239 = vmatpush.msra.mxu2 %v69_v23 }
  0x28   :  { %240 = vmatpush.msra.mxu3 %v69_v23 }
  0x29   :  { %118 = vmatpush.msra.mxu0 %v68_v24  ;;  %241 = vmatpush.msra.mxu2 %v68_v24 }
  0x2a   :  { %242 = vmatpush.msra.mxu3 %v68_v24 }
  0x2b   :  { %119 = vmatpush.msra.mxu0 %v67_v25  ;;  %243 = vmatpush.msra.mxu2 %v67_v25 }
  0x2c   :  { %244 = vmatpush.msra.mxu3 %v67_v25  ;;  %120 = vmatmul.f32.vlgmr.msra.gmra.mxu0 %v59_v26 }
  0x2d   :  { %123 = vmatmul.f32.vlgmr.msra.gmra.mxu2 %v61_v27  ;;  %126 = vmatmul.f32.vlgmr.msra.gmra.mxu3 %v63_v28 }
  0x2e   :  { %211 = vmatmul.msk.f32.gmra.mxu1 %vm91_vm0, %v64_v29 }
  0x35   :  { %129 = vmatmul.f32.gmra.mxu3 %v65_v30 }
  0x36   :  { %212 = vmatmul.msk.f32.gmra.mxu1 %vm91_vm0, %v66_v31 }
  0x9b   :  { %v150_v32 = vpop.f32.mrf.mxu1 }
  0xa3   :  { %v153_v33 = vpop.f32.mrf.mxu1 }
  0xa9   :  { %v121_v35 = vpop.f32.mrf.mxu0 }
  0xaa   :  { %v151_v36 = vadd.f32 %v150_v32, %v121_v35 }
  0xab   :  { %v156_v38 = vpop.f32.mrf.mxu1 }
  0xac   :  { %v181_v37 = vadd.f32 %v252_v34, %v151_v36 }
  0xae   :  { %185 = vst [vmem:[#allocation8] sm:$0xff] %v181_v37 }
  0xb0   :  { %v124_v39 = vpop.f32.mrf.mxu2  ;;  %v127_v40 = vpop.f32.mrf.mxu3 }
  0xb1   :  { %v154_v41 = vadd.f32 %v153_v33, %v124_v39  ;;  %v157_v42 = vadd.f32 %v156_v38, %v127_v40 }
  0xb3   :  { %v182_v43 = vadd.f32 %v252_v34, %v154_v41  ;;  %v183_v44 = vadd.f32 %v252_v34, %v157_v42  ;;  %v159_v45 = vpop.f32.mrf.mxu1 }
  0xb5   :  { %186 = vst [vmem:[#allocation8 + $0x8] sm:$0xff] %v182_v43 }
  0xb6   :  { %187 = vst [vmem:[#allocation8 + $0x10] sm:$0xff] %v183_v44 }
  0xb8   :  { %v130_v46 = vpop.f32.mrf.mxu3 }
  0xb9   :  { %v160_v47 = vadd.f32 %v159_v45, %v130_v46 }
  0xbb   :  { %v184_v48 = vadd.f32 %v252_v34, %v160_v47 }
  0xbd   :  { %188 = vst [vmem:[#allocation8 + $0x18] sm:$0xff] %v184_v48 }
  0xbe   :  { %201 = dma.vmem_to_hbm [thread:$0]  %s194_s27, 512, %s196_s2, [#allocation5], %s335_s24, %s335_s24, %s336_s25  }
  0xbf   :  { %329 = dma.done.wait [#allocation5], 512  }
  0xc0   :  { %330 = vsyncadd [#allocation5], 4294966784 }
  0xc1   :  { %206 = vsyncpa [#allocation4], 1 }
  0xc2   :  { %207 = vsyncpa [#allocation7], 1 }
  0xc3   :  { %208 = vsyncpa [#allocation5], 1 }

</bundles_post_ra>
